<compile_context>
chip_gen: v6e
topology: v6e:2x2x1
jax: 0.10.0
libtpu: 0.0.40
codegen_flags: <defaults>
</compile_context>

<pallas_src>
import jax
import jax.numpy as jnp
from jax.experimental import pallas as pl
from jax.experimental.pallas import tpu as pltpu

# ----------------------------- configuration ------------------------------
OBS_DIM = 16
HID = 32
ID_DIM = 16
ACT_DIM = 8
AGENT_NUM = 4
LN_EPS = 1e-5

IN_W = 2 * HID            # 64: packed input / working width
TILE_B = 128              # rows per grid step for large batches

# ---- packed input lane layout (all inside one [B, IN_W] buffer) ----------
#   lanes  0..15 : inputs (OBS_DIM)
#   lanes 16..23 : actions (ACT_DIM)
#   lanes 24..27 : one-hot(agent id) (AGENT_NUM)
#   lane     28  : 1.0  (bias lane for the fused encoder matmul)
#   lanes 29..31 : 0
#   lanes 32..63 : hidden_state (HID)

# ---- packed parameter row layout (one [P_ROWS, IN_W] f32 buffer) ----------
OFF_W_ENC = 0      # [64, 64] block-diagonal encoder (+bias row, +identity)
OFF_W1 = 64        # [64, 64] fc1 weight in cols 0..31, cols 32..63 zero
OFF_W2 = 128       # [64, 64] fc2 weight in rows 0..31 / cols 0..7, rest zero
OFF_LN_G = 192     # row 192: layernorm gamma tiled to 64 lanes
OFF_LN_B = 200     # row 200: layernorm beta  tiled to 64 lanes
OFF_B1 = 208       # row 208: fc1 bias (lanes 0..31), rest zero
OFF_B2 = 216       # row 216: fc2 bias (lanes 0..7),  rest zero
P_ROWS = 224


def _round_up(x, m):
    return ((x + m - 1) // m) * m


def pack_params(p):
    """Pack all parameters into one [P_ROWS, IN_W] f32 array (done once)."""
    f32 = jnp.float32

    # fused encoder weight: pre = packed_input @ w_enc
    w_enc = jnp.zeros((IN_W, IN_W), f32)
    w_enc = w_enc.at[0:OBS_DIM, 0:HID].set(p["w_obs"])                       # obs -> lanes 0..31
    w_enc = w_enc.at[16:16 + ACT_DIM, HID:HID + (HID - ID_DIM)].set(p["w_act"])  # act -> lanes 32..47
    w_enc = w_enc.at[24:24 + AGENT_NUM, HID + (HID - ID_DIM):IN_W].set(p["e_id"])  # id  -> lanes 48..63
    bias_row = jnp.concatenate(
        [p["b_obs"], p["b_act"], jnp.zeros((1, ID_DIM), f32)], axis=-1)      # [1, 64]
    w_enc = w_enc.at[28:29, :].set(bias_row)                                 # ones-lane -> biases
    w_enc = w_enc.at[HID:IN_W, HID:IN_W].set(jnp.eye(HID, dtype=f32))        # hidden passthrough

    w1p = jnp.zeros((IN_W, IN_W), f32).at[:, :HID].set(p["w1"])              # [64, 64]
    w2p = jnp.zeros((IN_W, IN_W), f32).at[:HID, :ACT_DIM].set(p["w2"])       # [64, 64]

    def row_block(v):
        r = jnp.zeros((8, IN_W), f32)
        return r.at[0:1, :v.shape[-1]].set(v)

    ln_g2 = jnp.concatenate([p["ln_g"], p["ln_g"]], axis=-1)                 # [1, 64]
    ln_b2 = jnp.concatenate([p["ln_b"], p["ln_b"]], axis=-1)                 # [1, 64]

    packed = jnp.concatenate([
        w_enc,                 # rows   0..63
        w1p,                   # rows  64..127
        w2p,                   # rows 128..191
        row_block(ln_g2),      # rows 192..199
        row_block(ln_b2),      # rows 200..207
        row_block(p["b1"]),    # rows 208..215
        row_block(p["b2"]),    # rows 216..223
    ], axis=0)
    assert packed.shape == (P_ROWS, IN_W)
    return packed


# ------------------------------- kernel -----------------------------------
def mlp_agent1_kernel(x_ref, p_ref, out_ref):
    x = x_ref[...]                                         # [TB, 64]

    # static, sublane-aligned views into the resident parameter buffer
    w_enc = p_ref[OFF_W_ENC:OFF_W_ENC + IN_W, :]
    w1 = p_ref[OFF_W1:OFF_W1 + IN_W, :]
    w2 = p_ref[OFF_W2:OFF_W2 + IN_W, :]
    ln_g = p_ref[OFF_LN_G:OFF_LN_G + 1, :]
    ln_b = p_ref[OFF_LN_B:OFF_LN_B + 1, :]
    b1 = p_ref[OFF_B1:OFF_B1 + 1, :]
    b2 = p_ref[OFF_B2:OFF_B2 + 1, :]

    # one block-diagonal matmul: lanes 0..31 = obs branch pre-act,
    # lanes 32..63 = act/id branch pre-act (+hidden), biases via ones-lane.
    pre = jnp.dot(x, w_enc, preferred_element_type=jnp.float32)   # [TB, 64]

    # fused per-half layernorm (+relu) in place, var = E[x^2] - mu^2
    lane = jax.lax.broadcasted_iota(jnp.int32, pre.shape, 1)
    hi = lane >= HID
    inv_n = 1.0 / HID

    s_all = jnp.sum(pre, axis=-1, keepdims=True)
    s_hi = jnp.sum(jnp.where(hi, pre, 0.0), axis=-1, keepdims=True)
    mu = jnp.where(hi, s_hi, s_all - s_hi) * inv_n

    sq = pre * pre
    q_all = jnp.sum(sq, axis=-1, keepdims=True)
    q_hi = jnp.sum(jnp.where(hi, sq, 0.0), axis=-1, keepdims=True)
    msq = jnp.where(hi, q_hi, q_all - q_hi) * inv_n

    var = msq - mu * mu
    acted = jnp.maximum(
        (pre - mu) * jax.lax.rsqrt(var + LN_EPS) * ln_g + ln_b, 0.0)

    # fc1 (original [64,32] weight padded to 64 output lanes -> upper lanes 0)
    h = jnp.maximum(
        jnp.dot(acted, w1, preferred_element_type=jnp.float32) + b1, 0.0)

    # fc2 (padded); valid result lives in lanes 0..ACT_DIM-1
    out_ref[...] = jnp.dot(h, w2, preferred_element_type=jnp.float32) + b2


# ------------------------------- wrapper -----------------------------------
def mlp_agent1_forward(inputs, actions, ids, hidden_state, packed_params,
                       *, tile_b=TILE_B):
    """inputs [B,OBS_DIM] f32, actions [B,ACT_DIM] f32, ids [B] int32,
    hidden_state [B,HID] f32, packed_params [P_ROWS,IN_W] f32.
    Returns [B,ACT_DIM] f32."""
    B = inputs.shape[0]
    f32 = jnp.float32

    # single fused staging op: [inp | act | one_hot | 1 | 0s | hidden]
    one_hot = (ids.astype(jnp.int32)[:, None]
               == jnp.arange(AGENT_NUM, dtype=jnp.int32)[None, :]).astype(f32)
    x_in = jnp.concatenate([
        inputs.astype(f32),
        actions.astype(f32),
        one_hot,
        jnp.ones((B, 1), f32),
        jnp.zeros((B, 3), f32),
        hidden_state.astype(f32),
    ], axis=-1)                                            # [B, 64]

    tb = min(tile_b, _round_up(max(B, 1), 8))
    b_pad = _round_up(B, tb)
    if b_pad != B:
        x_in = jnp.pad(x_in, ((0, b_pad - B), (0, 0)))
    grid = (b_pad // tb,)

    cost = pl.CostEstimate(
        flops=int(b_pad) * (3 * 2 * IN_W * IN_W + 16 * IN_W),
        transcendentals=2 * int(b_pad),
        bytes_accessed=(2 * b_pad * IN_W + P_ROWS * IN_W) * 4,
    )

    out = pl.pallas_call(
        mlp_agent1_kernel,
        out_shape=jax.ShapeDtypeStruct((b_pad, IN_W), f32),
        grid_spec=pltpu.PrefetchScalarGridSpec(
            num_scalar_prefetch=0,
            grid=grid,
            in_specs=[
                pl.BlockSpec((tb, IN_W), lambda i: (i, 0)),        # batch tile
                pl.BlockSpec((P_ROWS, IN_W), lambda i: (0, 0)),    # params: resident
            ],
            out_specs=pl.BlockSpec((tb, IN_W), lambda i: (i, 0)),
        ),
        compiler_params=pltpu.CompilerParams(
            dimension_semantics=("parallel",)),
        cost_estimate=cost,
    )(x_in, packed_params)

    return out[:B, :ACT_DIM]


# --------------------------- reference (pure JAX) ---------------------------
def reference_forward(inputs, actions, ids, hidden_state, p):
    def ln(x):
        mu = jnp.mean(x, axis=-1, keepdims=True)
        var = jnp.mean((x - mu) ** 2, axis=-1, keepdims=True)
        return (x - mu) / jnp.sqrt(var + LN_EPS) * p["ln_g"] + p["ln_b"]

    x = inputs @ p["w_obs"] + p["b_obs"]
    x = jnp.maximum(ln(x), 0.0)
    act_rep = jnp.concatenate(
        [actions @ p["w_act"] + p["b_act"], p["e_id"][ids]], axis=-1)
    act_rep = act_rep + hidden_state
    act_rep = jnp.maximum(ln(act_rep), 0.0)
    h = jnp.maximum(jnp.concatenate([x, act_rep], -1) @ p["w1"] + p["b1"], 0.0)
    return h @ p["w2"] + p["b2"]


# --------------------------------- main -------------------------------------
def make_params(key):
    ks = jax.random.split(key, 10)

    def lin(kw, fan_in, fan_out):
        bound = 1.0 / jnp.sqrt(fan_in)
        return jax.random.uniform(kw, (fan_in, fan_out), jnp.float32,
                                  -bound, bound)

    return {
        "w_obs": lin(ks[0], OBS_DIM, HID),
        "b_obs": jax.random.uniform(ks[1], (1, HID), jnp.float32, -0.1, 0.1),
        "w_act": lin(ks[2], ACT_DIM, HID - ID_DIM),
        "b_act": jax.random.uniform(ks[3], (1, HID - ID_DIM), jnp.float32,
                                    -0.1, 0.1),
        "e_id": jax.random.normal(ks[4], (AGENT_NUM, ID_DIM), jnp.float32),
        "w1": lin(ks[5], 2 * HID, HID),
        "b1": jax.random.uniform(ks[6], (1, HID), jnp.float32, -0.1, 0.1),
        "w2": lin(ks[7], HID, ACT_DIM),
        "b2": jax.random.uniform(ks[8], (1, ACT_DIM), jnp.float32, -0.1, 0.1),
        "ln_g": jnp.ones((1, HID), jnp.float32),
        "ln_b": jnp.zeros((1, HID), jnp.float32),
    }


def make_inputs(keys, batch):
    inputs = jax.random.normal(keys[0], (batch, OBS_DIM), jnp.float32)
    actions = jax.random.normal(keys[1], (batch, ACT_DIM), jnp.float32)
    ids = jax.random.randint(keys[2], (batch,), 0, AGENT_NUM, jnp.int32)
    hidden = jax.random.normal(keys[3], (batch, HID), jnp.float32)
    return inputs, actions, ids, hidden


if __name__ == "__main__":
    ks = jax.random.split(jax.random.PRNGKey(0), 9)
    params = make_params(ks[8])
    packed = jax.block_until_ready(pack_params(params))   # pack once, up front

    # small-shape demo (B = 8, single grid step)
    B_SMALL = 8
    inputs, actions, ids, hidden = make_inputs(ks[0:4], B_SMALL)
    out = jax.block_until_ready(
        mlp_agent1_forward(inputs, actions, ids, hidden, packed))
    ref = reference_forward(inputs, actions, ids, hidden, params)
    assert out.shape == (B_SMALL, ACT_DIM)
    assert jnp.allclose(out, ref, atol=1e-4, rtol=1e-4), "mismatch (B=8)"

    # larger batch exercises the batch grid, batch padding and parallel axis
    B_BIG = 300   # non-multiple of TILE_B -> pads to 384, grid=(3,)
    inputs, actions, ids, hidden = make_inputs(ks[4:8], B_BIG)
    out = jax.block_until_ready(
        mlp_agent1_forward(inputs, actions, ids, hidden, packed))
    ref = reference_forward(inputs, actions, ids, hidden, params)
    assert out.shape == (B_BIG, ACT_DIM)
    assert jnp.allclose(out, ref, atol=1e-4, rtol=1e-4), "mismatch (B=300)"

    print("KERNEL_OK")
</pallas_src>

<mosaic_0001>
module attributes {stable_mosaic.version = 11 : i64} {
  func.func @mlp_agent1_kernel(%arg0: i32, %arg1: memref<8x64xf32, #tpu.memory_space<vmem>>, %arg2: memref<224x64xf32, #tpu.memory_space<vmem>>, %arg3: memref<8x64xf32, #tpu.memory_space<vmem>>) attributes {dimension_semantics = [#tpu.dimension_semantics<parallel>], iteration_bounds = array<i64: 1>, scalar_prefetch = 0 : i64, scratch_operands = 0 : i64, tpu.core_type = #tpu.core_type<tc>, window_params = [{transform_indices = @transform_0, window_bounds = array<i64: 8, 64>}, {pipeline_mode = #tpu.pipeline_mode<synchronous>, transform_indices = @transform_1, window_bounds = array<i64: 224, 64>}, {transform_indices = @transform_2, window_bounds = array<i64: 8, 64>}]} {
    %c0 = arith.constant 0 : index
    %c0_0 = arith.constant 0 : index
    %0 = vector.load %arg1[%c0, %c0_0] : memref<8x64xf32, #tpu.memory_space<vmem>>, vector<8x64xf32>
    %c0_1 = arith.constant 0 : index
    %c0_2 = arith.constant 0 : index
    %1 = vector.load %arg2[%c0_1, %c0_2] : memref<224x64xf32, #tpu.memory_space<vmem>>, vector<64x64xf32>
    %c64 = arith.constant 64 : index
    %c0_3 = arith.constant 0 : index
    %2 = vector.load %arg2[%c64, %c0_3] : memref<224x64xf32, #tpu.memory_space<vmem>>, vector<64x64xf32>
    %c128 = arith.constant 128 : index
    %c0_4 = arith.constant 0 : index
    %3 = vector.load %arg2[%c128, %c0_4] : memref<224x64xf32, #tpu.memory_space<vmem>>, vector<64x64xf32>
    %c192 = arith.constant 192 : index
    %c0_5 = arith.constant 0 : index
    %4 = vector.load %arg2[%c192, %c0_5] : memref<224x64xf32, #tpu.memory_space<vmem>>, vector<1x64xf32>
    %c200 = arith.constant 200 : index
    %c0_6 = arith.constant 0 : index
    %5 = vector.load %arg2[%c200, %c0_6] : memref<224x64xf32, #tpu.memory_space<vmem>>, vector<1x64xf32>
    %c208 = arith.constant 208 : index
    %c0_7 = arith.constant 0 : index
    %6 = vector.load %arg2[%c208, %c0_7] : memref<224x64xf32, #tpu.memory_space<vmem>>, vector<1x64xf32>
    %c216 = arith.constant 216 : index
    %c0_8 = arith.constant 0 : index
    %7 = vector.load %arg2[%c216, %c0_8] : memref<224x64xf32, #tpu.memory_space<vmem>>, vector<1x64xf32>
    %cst = arith.constant dense<0.000000e+00> : vector<8x64xf32>
    %8 = tpu.matmul %0, %1, %cst {dimension_numbers = #tpu.dot_dimension_numbers<[1], [0], [0], [1], [0, 0, 1, 1], [], []>} : vector<8x64xf32>, vector<64x64xf32>, vector<8x64xf32> -> vector<8x64xf32>
    %9 = tpu.iota {dimensions = array<i32: 1>} : vector<8x64xi32>
    %c32_i32 = arith.constant 32 : i32
    %10 = vector.broadcast %c32_i32 : i32 to vector<8x64xi32>
    %11 = arith.cmpi sge, %9, %10 : vector<8x64xi32>
    %cst_9 = arith.constant dense<0.000000e+00> : vector<8xf32>
    %12 = vector.multi_reduction <add>, %8, %cst_9 [1] : vector<8x64xf32> to vector<8xf32>
    %13 = vector.shape_cast %12 : vector<8xf32> to vector<8x1xf32>
    %cst_10 = arith.constant 0.000000e+00 : f32
    %14 = vector.broadcast %cst_10 : f32 to vector<8x64xf32>
    %15 = arith.select %11, %8, %14 : vector<8x64xi1>, vector<8x64xf32>
    %cst_11 = arith.constant dense<0.000000e+00> : vector<8xf32>
    %16 = vector.multi_reduction <add>, %15, %cst_11 [1] : vector<8x64xf32> to vector<8xf32>
    %17 = vector.shape_cast %16 : vector<8xf32> to vector<8x1xf32>
    %18 = arith.subf %13, %17 : vector<8x1xf32>
    %19 = vector.shape_cast %17 : vector<8x1xf32> to vector<8x1xf32>
    %20 = vector.broadcast %19 : vector<8x1xf32> to vector<8x64xf32>
    %21 = vector.shape_cast %18 : vector<8x1xf32> to vector<8x1xf32>
    %22 = vector.broadcast %21 : vector<8x1xf32> to vector<8x64xf32>
    %23 = arith.select %11, %20, %22 : vector<8x64xi1>, vector<8x64xf32>
    %cst_12 = arith.constant 3.125000e-02 : f32
    %24 = vector.broadcast %cst_12 : f32 to vector<8x64xf32>
    %25 = arith.mulf %23, %24 : vector<8x64xf32>
    %26 = arith.mulf %8, %8 : vector<8x64xf32>
    %cst_13 = arith.constant dense<0.000000e+00> : vector<8xf32>
    %27 = vector.multi_reduction <add>, %26, %cst_13 [1] : vector<8x64xf32> to vector<8xf32>
    %28 = vector.shape_cast %27 : vector<8xf32> to vector<8x1xf32>
    %cst_14 = arith.constant 0.000000e+00 : f32
    %29 = vector.broadcast %cst_14 : f32 to vector<8x64xf32>
    %30 = arith.select %11, %26, %29 : vector<8x64xi1>, vector<8x64xf32>
    %cst_15 = arith.constant dense<0.000000e+00> : vector<8xf32>
    %31 = vector.multi_reduction <add>, %30, %cst_15 [1] : vector<8x64xf32> to vector<8xf32>
    %32 = vector.shape_cast %31 : vector<8xf32> to vector<8x1xf32>
    %33 = arith.subf %28, %32 : vector<8x1xf32>
    %34 = vector.shape_cast %32 : vector<8x1xf32> to vector<8x1xf32>
    %35 = vector.broadcast %34 : vector<8x1xf32> to vector<8x64xf32>
    %36 = vector.shape_cast %33 : vector<8x1xf32> to vector<8x1xf32>
    %37 = vector.broadcast %36 : vector<8x1xf32> to vector<8x64xf32>
    %38 = arith.select %11, %35, %37 : vector<8x64xi1>, vector<8x64xf32>
    %cst_16 = arith.constant 3.125000e-02 : f32
    %39 = vector.broadcast %cst_16 : f32 to vector<8x64xf32>
    %40 = arith.mulf %38, %39 : vector<8x64xf32>
    %41 = arith.mulf %25, %25 : vector<8x64xf32>
    %42 = arith.subf %40, %41 : vector<8x64xf32>
    %43 = arith.subf %8, %25 : vector<8x64xf32>
    %cst_17 = arith.constant 9.99999974E-6 : f32
    %44 = vector.broadcast %cst_17 : f32 to vector<8x64xf32>
    %45 = arith.addf %42, %44 : vector<8x64xf32>
    %46 = math.rsqrt %45 : vector<8x64xf32>
    %47 = arith.mulf %43, %46 : vector<8x64xf32>
    %48 = vector.broadcast %4 : vector<1x64xf32> to vector<8x64xf32>
    %49 = arith.mulf %47, %48 : vector<8x64xf32>
    %50 = vector.broadcast %5 : vector<1x64xf32> to vector<8x64xf32>
    %51 = arith.addf %49, %50 : vector<8x64xf32>
    %cst_18 = arith.constant 0.000000e+00 : f32
    %52 = vector.broadcast %cst_18 : f32 to vector<8x64xf32>
    %53 = arith.maximumf %51, %52 : vector<8x64xf32>
    %cst_19 = arith.constant dense<0.000000e+00> : vector<8x64xf32>
    %54 = tpu.matmul %53, %2, %cst_19 {dimension_numbers = #tpu.dot_dimension_numbers<[1], [0], [0], [1], [0, 0, 1, 1], [], []>} : vector<8x64xf32>, vector<64x64xf32>, vector<8x64xf32> -> vector<8x64xf32>
    %55 = vector.broadcast %6 : vector<1x64xf32> to vector<8x64xf32>
    %56 = arith.addf %54, %55 : vector<8x64xf32>
    %cst_20 = arith.constant 0.000000e+00 : f32
    %57 = vector.broadcast %cst_20 : f32 to vector<8x64xf32>
    %58 = arith.maximumf %56, %57 : vector<8x64xf32>
    %cst_21 = arith.constant dense<0.000000e+00> : vector<8x64xf32>
    %59 = tpu.matmul %58, %3, %cst_21 {dimension_numbers = #tpu.dot_dimension_numbers<[1], [0], [0], [1], [0, 0, 1, 1], [], []>} : vector<8x64xf32>, vector<64x64xf32>, vector<8x64xf32> -> vector<8x64xf32>
    %60 = vector.broadcast %7 : vector<1x64xf32> to vector<8x64xf32>
    %61 = arith.addf %59, %60 : vector<8x64xf32>
    %c0_22 = arith.constant 0 : index
    %c0_23 = arith.constant 0 : index
    %62 = vector.load %arg3[%c0_22, %c0_23] : memref<8x64xf32, #tpu.memory_space<vmem>>, vector<8x64xf32>
    tpu.vector_store %arg3[%c0_22, %c0_23], %61 {strides = array<i32>} : memref<8x64xf32, #tpu.memory_space<vmem>>, vector<8x64xf32>,
    return
  }
  func.func @transform_0(%arg0: i32) -> (i32, i32) {
    %c0_i32 = arith.constant 0 : i32
    %c0_i32_0 = arith.constant 0 : i32
    return %arg0, %c0_i32 : i32, i32
  }
  func.func @transform_1(%arg0: i32) -> (i32, i32) {
    %c0_i32 = arith.constant 0 : i32
    %c0_i32_0 = arith.constant 0 : i32
    %c0_i32_1 = arith.constant 0 : i32
    return %c0_i32, %c0_i32_0 : i32, i32
  }
  func.func @transform_2(%arg0: i32) -> (i32, i32) {
    %c0_i32 = arith.constant 0 : i32
    %c0_i32_0 = arith.constant 0 : i32
    return %arg0, %c0_i32 : i32, i32
  }
}

</mosaic_0001>

<bundles_post_ra>
// kernel: tpu_custom_call.1
= control target key start
LH: loop header
LB: loop body
LE: loop exit
PB: predicated region body
PF: predicated region fallthrough
CT: control target
= control target key end

     0   :  { %v444_v1 = vmov 0.0   ;;  %vm445_vm0 = vmmov 0   ;;  %s608_s0 = inlined_call_operand.vmem [shape: f32[8,64], index: 0, kind: input, shape index: {}]   ;;  %s609_s1 = inlined_call_operand.vmem [shape: f32[224,64], index: 1, kind: input, shape index: {}]   ;;  %s610_s2 = inlined_call_operand.hbm [shape: f32[8,64], index: 2, kind: output, shape index: {}]  }
   0x1   :  { %v20_v0 = vld [vmem:[%s609_s1 + $0x38] sm:$0xff]  ;;  %360 = vmatprep.subr.mxu0 %v444_v1  ;;  %v19_v2 = vld [vmem:[%s609_s1 + $0x30] sm:$0xff]  ;;  %376 = vmatprep.mubr.msk.f32.mxu0 %vm445_vm0, %v444_v1  ;;  %v18_v3 = vld [vmem:[%s609_s1 + $0x28] sm:$0xff] }
   0x2   :  { %361 = vmatpush3.msra.mxu0 %v20_v0  ;;  %379 = vmatprep.subr.mxu1 %v444_v1 }
   0x3   :  { %362 = vmatprep.subr.mxu0 %v444_v1  ;;  %395 = vmatprep.mubr.msk.f32.mxu1 %vm445_vm0, %v444_v1 }
   0x4   :  { %7 = vsyncpa [#allocation3], 0  ;;  %363 = vmatpush3.msra.mxu0 %v19_v2  ;;  %v17_v4 = vld [vmem:[%s609_s1 + $0x20] sm:$0xff]  ;;  %v16_v5 = vld [vmem:[%s609_s1 + $0x18] sm:$0xff]  ;;  %vm41_vm1 = vcmask 523264   ;;  %v115_v10 = vlaneseq  ;;  %s446_s9 = smov [#allocation2]  }
   0x5   :  { %364 = vmatprep.subr.mxu0 %v444_v1  ;;  %v15_v6 = vld [vmem:[%s609_s1 + $0x10] sm:$0xff]  ;;  %v14_v7 = vld [vmem:[%s609_s1 + $0x8] sm:$0xff]  ;;  %v13_v8 = vld [vmem:[%s609_s1] sm:$0xff]  ;;  %s318_s10 = sshll.u32 %s446_s9, 4  ;;  %s319_s10 = int_to_ptr.vmem [resolvable:$true] %s318_s10 }
   0x6   :  { %365 = vmatpush3.msra.mxu0 %v18_v3  ;;  %v12_v9 = vld [vmem:[%s608_s0] sm:$0xff]  ;;  %v506_v11 = vand.u32 127, %v115_v10  ;;  %v28_v21 = vld [vmem:[%s609_s1 + $0x78] sm:$0xff]  ;;  %v27_v22 = vld [vmem:[%s609_s1 + $0x70] sm:$0xff]  ;;  %s422_s11 = scalar_lea.vmem %s319_s10, 128  ;;  %p427_p1 = scmp.lt.s32.totalorder %s319_s10, %s319_s10 }
   0x7   :  { %366 = vmatprep.subr.mxu0 %v444_v1  ;;  %380 = vmatpush3.msra.mxu1 %v28_v21  ;;  %v26_v23 = vld [vmem:[%s609_s1 + $0x68] sm:$0xff]  ;;  %v25_v24 = vld [vmem:[%s609_s1 + $0x60] sm:$0xff]  ;;  %v24_v25 = vld [vmem:[%s609_s1 + $0x58] sm:$0xff]  ;;  %p423_p0 = scmp.ne.s32.totalorder %s319_s10, %s422_s11  ;;  %p428_p2 = scmp.lt.s32.totalorder %s422_s11, %s422_s11 }
   0x8   :  { %367 = vmatpush3.msra.mxu0 %v17_v4  ;;  %vm117_vm2 = vcmp.ge.s32.totalorder %v506_v11, 32  ;;  %381 = vmatprep.subr.mxu1 %v444_v1  ;;  %v23_v26 = vld [vmem:[%s609_s1 + $0x50] sm:$0xff]  ;;  %v22_v27 = vld [vmem:[%s609_s1 + $0x48] sm:$0xff]  ;;  %v21_v28 = vld [vmem:[%s609_s1 + $0x40] sm:$0xff] }
   0x9   :  { %368 = vmatprep.subr.mxu0 %v444_v1  ;;  %382 = vmatpush3.msra.mxu1 %v27_v22  ;;  %v36_v29 = vld [vmem:[%s609_s1 + $0xb8] sm:$0xff]  ;;  %v35_v30 = vld [vmem:[%s609_s1 + $0xb0] sm:$0xff]  ;;  %v34_v31 = vld [vmem:[%s609_s1 + $0xa8] sm:$0xff]  ;;  %p429_p3 = por %p428_p2, %p427_p1 }
   0xa   :  { %369 = vmatpush3.msra.mxu0 %v16_v5  ;;  %383 = vmatprep.subr.mxu1 %v444_v1  ;;  %v33_v32 = vld [vmem:[%s609_s1 + $0xa0] sm:$0xff]  ;;  %v32_v33 = vld [vmem:[%s609_s1 + $0x98] sm:$0xff]  ;;  %v328_v51 = vld [vmem:[%s609_s1 + $0xc8] ss:$0 sm:$0xff] }
   0xb   :  { %370 = vmatprep.subr.mxu0 %v444_v1  ;;  %384 = vmatpush3.msra.mxu1 %v26_v23  ;;  %v327_v49 = vld [vmem:[%s609_s1 + $0xc0] ss:$0 sm:$0xff]  ;;  %v31_v55 = vld [vmem:[%s609_s1 + $0x90] sm:$0xff]  ;;  %v30_v56 = vld [vmem:[%s609_s1 + $0x88] sm:$0xff]  ;;  %p430_p4 = pnand %p429_p3, %p423_p0 }
   0xc   :  { %371 = vmatpush3.msra.mxu0 %v15_v6  ;;  %385 = vmatprep.subr.mxu1 %v444_v1  ;;  %v29_v57 = vld [vmem:[%s609_s1 + $0x80] sm:$0xff]  ;;  %v329_v58 = vld [vmem:[%s609_s1 + $0xd0] ss:$0 sm:$0xff]  ;;  %v331_v63 = vld [vmem:[%s609_s1 + $0xd8] ss:$0 sm:$0xff] }
   0xd   :  { %372 = vmatprep.subr.mxu0 %v444_v1  ;;  %386 = vmatpush3.msra.mxu1 %v25_v24 }
   0xe   :  { %373 = vmatpush3.msra.mxu0 %v14_v7  ;;  %387 = vmatprep.subr.mxu1 %v444_v1 }
   0xf   :  { %374 = vmatprep.subr.mxu0 %v444_v1  ;;  %388 = vmatpush3.msra.mxu1 %v24_v25 }
  0x10   :  { %375 = vmatpush3.msra.mxu0 %v13_v8  ;;  %389 = vmatprep.subr.mxu1 %v444_v1 }
  0x11   :  { %377 = vmatmul.mubr.msk.f32.vlgmr.msra.gmra.mxu0 %vm41_vm1, %v12_v9  ;;  %398 = vmatprep.subr.mxu0 %v444_v1 }
  0x12   :  { %414 = vmatprep.mubr.msk.f32.mxu0 %vm445_vm0, %v444_v1  ;;  %390 = vmatpush3.msra.mxu1 %v23_v26 }
  0x13   :  { %391 = vmatprep.subr.mxu1 %v444_v1  ;;  %399 = vmatpush3.msra.mxu0 %v36_v29 }
  0x14   :  { %392 = vmatpush3.msra.mxu1 %v22_v27  ;;  %400 = vmatprep.subr.mxu0 %v444_v1 }
  0x15   :  { %393 = vmatprep.subr.mxu1 %v444_v1  ;;  %401 = vmatpush3.msra.mxu0 %v35_v30 }
  0x16   :  { %394 = vmatpush3.msra.mxu1 %v21_v28  ;;  %402 = vmatprep.subr.mxu0 %v444_v1 }
  0x17   :  { %403 = vmatpush3.msra.mxu0 %v34_v31 }
  0x18   :  { %404 = vmatprep.subr.mxu0 %v444_v1 }
  0x19   :  { %405 = vmatpush3.msra.mxu0 %v33_v32 }
  0x1a   :  { %406 = vmatprep.subr.mxu0 %v444_v1 }
  0x1b   :  { %407 = vmatpush3.msra.mxu0 %v32_v33 }
  0x1c   :  { %408 = vmatprep.subr.mxu0 %v444_v1 }
  0x1d   :  { %409 = vmatpush3.msra.mxu0 %v31_v55 }
  0x1e   :  { %410 = vmatprep.subr.mxu0 %v444_v1 }
  0x1f   :  { %411 = vmatpush3.msra.mxu0 %v30_v56 }
  0x20   :  { %412 = vmatprep.subr.mxu0 %v444_v1 }
  0x21   :  { %413 = vmatpush3.msra.mxu0 %v29_v57 }
  0xd1   :  { %v509_v12 = vpop.f32.mrf.mxu0 }
  0xd2   :  { %v118_v13 = vsel %vm41_vm1, %v509_v12, 0.0  ;;  %v128_v14 = vmul.f32 %v509_v12, %v509_v12  ;;  %v121_v16 = vsel %vm117_vm2, %v509_v12, 0.0 }
  0xd3   :  { %119 = vadd.xlane.f32.xlu0 %v118_v13  ;;  %v378_v15 = vpop.f32.mrf.mxu0  ;;  %v122_v19 = vsel %vm41_vm1, %v121_v16, 0.0 }
  0xd4   :  { %v129_v17 = vsel %vm41_vm1, %v128_v14, 0.0  ;;  %v132_v18 = vsel %vm117_vm2, %v128_v14, 0.0 }
  0xd5   :  { %130 = vadd.xlane.f32.xlu1 %v129_v17  ;;  %v133_v20 = vsel %vm41_vm1, %v132_v18, 0.0 }
  0xd7   :  { %123 = vadd.xlane.f32.xlu0 %v122_v19 }
  0xd9   :  { %134 = vadd.xlane.f32.xlu1 %v133_v20 }
 0x15c   :  { %v120_v34 = vpop.xlane.xlu0 %119 }
 0x15e   :  { %v131_v35 = vpop.xlane.xlu1 %130 }
 0x160   :  { %v124_v36 = vpop.xlane.xlu0 %123 }
 0x161   :  { %v125_v37 = vsub.f32 %v120_v34, %v124_v36 }
 0x162   :  { %v135_v38 = vpop.xlane.xlu1 %134 }
 0x163   :  { %v126_v39 = vsel %vm117_vm2, %v124_v36, %v125_v37  ;;  %v136_v40 = vsub.f32 %v131_v35, %v135_v38 }
 0x164   :  { %v127_v41 = vmul.f32 0.03125, %v126_v39 }
 0x165   :  { %v137_v42 = vsel %vm117_vm2, %v135_v38, %v136_v40 }
 0x166   :  { %v139_v43 = vmul.f32 %v127_v41, %v127_v41  ;;  %v138_v44 = vmul.f32 0.03125, %v137_v42  ;;  %v141_v47 = vsub.f32 %v509_v12, %v127_v41 }
 0x168   :  { %v140_v45 = vsub.f32 %v138_v44, %v139_v43 }
 0x16a   :  { %v142_v46 = vadd.f32 1e-05, %v140_v45 }
 0x16c   :  { %420 = vrsqrt.f32 %v142_v46 }
 0x179   :  { %v421_v48 = vpop.eup %420 }
 0x17a   :  { %v144_v50 = vmul.f32 %v421_v48, %v141_v47 }
 0x17c   :  { %v149_v52 = vmul.f32 %v327_v49, %v144_v50 }
 0x17e   :  { %v154_v53 = vadd.f32 %v328_v51, %v149_v52 }
 0x180   :  { %v155_v54 = vmax.f32 %v154_v53, 0.0 }
 0x182   :  { %396 = vmatmul.mubr.msk.f32.vlgmr.msra.gmra.mxu1 %vm41_vm1, %v155_v54 }
 0x242   :  { %v229_v59 = vpop.f32.mrf.mxu1 }
 0x243   :  { %v230_v60 = vadd.f32 %v329_v58, %v229_v59 }
 0x244   :  { %v397_v61 = vpop.f32.mrf.mxu1 }
 0x245   :  { %v233_v62 = vmax.f32 %v230_v60, 0.0 }
 0x247   :  { %415 = vmatmul.mubr.msk.f32.vlgmr.msra.gmra.mxu0 %vm41_vm1, %v233_v62 }
 0x307   :  { %v307_v0 = vpop.f32.mrf.mxu0 }
 0x308   :  { %v308_v1 = vadd.f32 %v331_v63, %v307_v0 }
 0x309   :  { %v416_v2 = vpop.f32.mrf.mxu0 }
 0x30a   :  { %311 = vst.msk [vmem:[#allocation2] sm:$0xff] %vm41_vm1, %v308_v1 }
 0x30b   :  { %433 = shalt.err (!%p430_p4)
}
 0x30c   :  { %321 = dma.vmem_to_hbm [thread:$0]  %s319_s10, 128, %s610_s2, [#allocation3]  }
 0x30d   :  { %442 = dma.done.wait [#allocation3], 128  }
 0x30e   :  { %443 = vsyncadd [#allocation3], 4294967168 }
 0x30f   :  { %325 = vsyncpa [#allocation3], 1 }

</bundles_post_ra>
